<compile_context>
chip_gen: v7x
topology: tpu7x:2x2x1
jax: 0.10.0
libtpu: 0.0.40
codegen_flags: <defaults>
</compile_context>

<pallas_src>
import functools
import math

import jax
import jax.numpy as jnp
from jax import lax
from jax.experimental import pallas as pl
from jax.experimental.pallas import tpu as pltpu


def _pick_tile(dim: int, pref: int, align: int) -> int:
    """Largest tile <= pref that is a multiple of `align` and divides `dim`;
    falls back to the full extent (either way the (8,128) BlockSpec rule holds).
    TODO(synk): pad/mask ragged tails instead of the full-extent fallback."""
    if dim <= pref:
        return dim
    for t in range(pref, align - 1, -align):
        if dim % t == 0:
            return t
    return dim


# -----------------------------------------------------------------------------
# Matmul kernels (projections). Single-K variant when K fits in one block
# (no scratch, no pl.when, both grid axes parallel); K-tiled accumulator otherwise.
# -----------------------------------------------------------------------------
def _mm_kernel(x_ref, w_ref, o_ref):
    o_ref[...] = jnp.dot(x_ref[...], w_ref[...],
                         preferred_element_type=jnp.float32).astype(o_ref.dtype)


def _mm_acc_kernel(x_ref, w_ref, o_ref, acc_ref, *, k_axis):
    @pl.when(pl.program_id(k_axis) == 0)
    def _():
        acc_ref[...] = jnp.zeros_like(acc_ref)

    acc_ref[...] += jnp.dot(x_ref[...], w_ref[...],
                            preferred_element_type=jnp.float32)

    @pl.when(pl.program_id(k_axis) == pl.num_programs(k_axis) - 1)
    def _():
        o_ref[...] = acc_ref[...].astype(o_ref.dtype)


def pallas_matmul(x, w, *, tm=256, tn=256, tk_max=1024, out_dtype=None):
    """x: [M, K], w: [K, N] -> [M, N] with f32 accumulation."""
    M, K = x.shape
    K2, N = w.shape
    assert K == K2, (K, K2)
    out_dtype = out_dtype or x.dtype
    tm = _pick_tile(M, tm, 8)
    tn = _pick_tile(N, tn, 128)

    if K <= tk_max:
        return pl.pallas_call(
            _mm_kernel,
            out_shape=jax.ShapeDtypeStruct((M, N), out_dtype),
            grid=(M // tm, N // tn),
            in_specs=[
                pl.BlockSpec((tm, K), lambda i, j: (i, 0)),
                pl.BlockSpec((K, tn), lambda i, j: (0, j)),
            ],
            out_specs=pl.BlockSpec((tm, tn), lambda i, j: (i, j)),
            compiler_params=pltpu.CompilerParams(
                dimension_semantics=("parallel", "parallel")),
        )(x, w)

    tk = _pick_tile(K, tk_max, 128)
    return pl.pallas_call(
        functools.partial(_mm_acc_kernel, k_axis=2),
        out_shape=jax.ShapeDtypeStruct((M, N), out_dtype),
        grid=(M // tm, N // tn, K // tk),
        in_specs=[
            pl.BlockSpec((tm, tk), lambda i, j, k: (i, k)),
            pl.BlockSpec((tk, tn), lambda i, j, k: (k, j)),
        ],
        out_specs=pl.BlockSpec((tm, tn), lambda i, j, k: (i, j)),
        scratch_shapes=[pltpu.VMEM((tm, tn), jnp.float32)],
        compiler_params=pltpu.CompilerParams(
            dimension_semantics=("parallel", "parallel", "arbitrary")),
    )(x, w)


def pallas_qkv_proj(x, wqkv3, *, tm=256, tn=256, tk_max=1024, out_dtype=None):
    """x: [M, d_model], wqkv3: [3, d_model, inner] -> [3, M, inner].
    The q/k/v 'part' is a grid axis, so the output is already in the layout the
    attention kernel consumes (no split / head transpose afterwards)."""
    M, K = x.shape
    three, K2, N = wqkv3.shape
    assert three == 3 and K == K2, (wqkv3.shape, x.shape)
    out_dtype = out_dtype or x.dtype
    tm = _pick_tile(M, tm, 8)
    tn = _pick_tile(N, tn, 128)

    if K <= tk_max:
        return pl.pallas_call(
            _mm_kernel,
            out_shape=jax.ShapeDtypeStruct((3, M, N), out_dtype),
            grid=(M // tm, N // tn, 3),          # part innermost: x block DMA'd once per (i)
            in_specs=[
                pl.BlockSpec((tm, K), lambda i, j, p: (i, 0)),
                pl.BlockSpec((None, K, tn), lambda i, j, p: (p, 0, j)),
            ],
            out_specs=pl.BlockSpec((None, tm, tn), lambda i, j, p: (p, i, j)),
            compiler_params=pltpu.CompilerParams(
                dimension_semantics=("parallel", "parallel", "arbitrary")),
        )(x, wqkv3)

    tk = _pick_tile(K, tk_max, 128)
    return pl.pallas_call(
        functools.partial(_mm_acc_kernel, k_axis=3),
        out_shape=jax.ShapeDtypeStruct((3, M, N), out_dtype),
        grid=(M // tm, N // tn, 3, K // tk),
        in_specs=[
            pl.BlockSpec((tm, tk), lambda i, j, p, k: (i, k)),
            pl.BlockSpec((None, tk, tn), lambda i, j, p, k: (p, k, j)),
        ],
        out_specs=pl.BlockSpec((None, tm, tn), lambda i, j, p, k: (p, i, j)),
        scratch_shapes=[pltpu.VMEM((tm, tn), jnp.float32)],
        compiler_params=pltpu.CompilerParams(
            dimension_semantics=("parallel", "parallel", "arbitrary", "arbitrary")),
    )(x, wqkv3)


# -----------------------------------------------------------------------------
# Flash-style attention core, all heads per grid step, lane-dense I/O.
# Grid: (B, Sq/tq, Skv/tkv); KV axis is the 'arbitrary' reduction with per-head
# online-softmax state (m, l, acc) in f32 VMEM scratch.
# Scores = q @ k^T + position_bias (+ key mask); T5 has NO 1/sqrt(d_kv) scaling.
# -----------------------------------------------------------------------------
def _make_flash_kernel(has_mask: bool):
    def kernel(q_ref, k_ref, v_ref, bias_ref, *rest):
        if has_mask:
            mask_ref, o_ref, m_sc, l_sc, acc_sc = rest
        else:
            o_ref, m_sc, l_sc, acc_sc = rest

        kv_i = pl.program_id(2)
        H = acc_sc.shape[0]
        d = acc_sc.shape[2]

        @pl.when(kv_i == 0)
        def _():
            # Finite floor (not -inf): fully-masked rows stay NaN-free.
            m_sc[...] = jnp.full_like(m_sc, -1e30)
            l_sc[...] = jnp.zeros_like(l_sc)
            acc_sc[...] = jnp.zeros_like(acc_sc)

        if has_mask:
            mask_row = mask_ref[...].astype(jnp.float32)           # (1, tkv)

        # Static per-head loop: q/k/v arrive lane-dense ((t, H*d_kv) blocks) and are
        # column-sliced per head in VMEM; no HBM head transposes anywhere.
        for h in range(H):
            sl = pl.ds(h * d, d)
            q_h = q_ref[:, sl]                                     # (tq, d_kv)
            k_h = k_ref[:, sl]                                     # (tkv, d_kv)
            v_h = v_ref[:, sl]                                     # (tkv, d_kv)

            s = lax.dot_general(q_h, k_h, (((1,), (1,)), ((), ())),
                                preferred_element_type=jnp.float32)  # (tq, tkv)
            s = s + bias_ref[h].astype(jnp.float32)
            if has_mask:
                s = s + mask_row

            m_prev = m_sc[h]                                       # (tq, 1)
            m_new = jnp.maximum(m_prev, s.max(axis=-1, keepdims=True))
            alpha = jnp.exp(m_prev - m_new)
            # TODO(synk): bf16 exp of (s - m_new) for v6e/v7x EUP throughput.
            p = jnp.exp(s - m_new)
            l_sc[h] = alpha * l_sc[h] + p.sum(axis=-1, keepdims=True)
            acc_sc[h] = alpha * acc_sc[h] + jnp.dot(
                p.astype(v_h.dtype), v_h, preferred_element_type=jnp.float32)
            m_sc[h] = m_new

        @pl.when(kv_i == pl.num_programs(2) - 1)
        def _():
            for h in range(H):
                l_h = l_sc[h]
                l_h = jnp.where(l_h == 0.0, 1.0, l_h)   # fully-masked rows -> 0, not NaN
                inv_l = pl.reciprocal(l_h, approx=True)
                o_ref[:, pl.ds(h * d, d)] = (acc_sc[h] * inv_l).astype(o_ref.dtype)

    return kernel


def flash_attention(qkv, bias, mask=None, *, n_heads, d_kv, tq=256, tkv=256):
    """qkv: [3, B, S, inner]; bias: [H, Sq, Skv]; mask: optional [B, 1, Skv].
    Returns ctx: [B, S, inner]."""
    _, B, S, inner = qkv.shape
    assert inner == n_heads * d_kv, (inner, n_heads, d_kv)
    tq = _pick_tile(S, tq, 128)
    tkv = _pick_tile(S, tkv, 128)
    grid = (B, S // tq, S // tkv)

    in_specs = [
        pl.BlockSpec((None, None, tq, inner), lambda b, qi, ki: (0, b, qi, 0)),
        pl.BlockSpec((None, None, tkv, inner), lambda b, qi, ki: (1, b, ki, 0)),
        pl.BlockSpec((None, None, tkv, inner), lambda b, qi, ki: (2, b, ki, 0)),
        # position bias is per-head only; never broadcast over batch.
        pl.BlockSpec((n_heads, tq, tkv), lambda b, qi, ki: (0, qi, ki)),
    ]
    args = [qkv, qkv, qkv, bias]
    if mask is not None:
        in_specs.append(pl.BlockSpec((None, 1, tkv), lambda b, qi, ki: (b, 0, ki)))
        args.append(mask)

    return pl.pallas_call(
        _make_flash_kernel(mask is not None),
        out_shape=jax.ShapeDtypeStruct((B, S, inner), qkv.dtype),
        grid=grid,
        in_specs=in_specs,
        out_specs=pl.BlockSpec((None, tq, inner), lambda b, qi, ki: (b, qi, 0)),
        scratch_shapes=[
            pltpu.VMEM((n_heads, tq, 1), jnp.float32),      # running max  m
            pltpu.VMEM((n_heads, tq, 1), jnp.float32),      # running sum  l
            pltpu.VMEM((n_heads, tq, d_kv), jnp.float32),   # output accumulator
        ],
        compiler_params=pltpu.CompilerParams(
            dimension_semantics=("parallel", "parallel", "arbitrary")),
    )(*args)


# -----------------------------------------------------------------------------
# Relative position bias (compute_bias): bucketize + embedding gather.
# Tiny gather-heavy preprocessing; done in plain JAX in the wrapper.
# -----------------------------------------------------------------------------
def _relative_position_bucket(relative_position, bidirectional=True,
                              num_buckets=32, max_distance=128):
    relative_buckets = jnp.zeros_like(relative_position)
    if bidirectional:
        num_buckets //= 2
        relative_buckets = relative_buckets + (
            relative_position > 0).astype(jnp.int32) * num_buckets
        relative_position = jnp.abs(relative_position)
    else:
        relative_position = -jnp.minimum(relative_position,
                                         jnp.zeros_like(relative_position))
    max_exact = num_buckets // 2
    is_small = relative_position < max_exact
    # clamp avoids log(0) -> -inf -> implementation-defined int cast
    safe_rp = jnp.maximum(relative_position, 1).astype(jnp.float32)
    rel_if_large = max_exact + (
        jnp.log(safe_rp / max_exact)
        / math.log(max_distance / max_exact)
        * (num_buckets - max_exact)
    ).astype(jnp.int32)
    rel_if_large = jnp.minimum(
        rel_if_large, jnp.full_like(rel_if_large, num_buckets - 1))
    relative_buckets = relative_buckets + jnp.where(
        is_small, relative_position, rel_if_large)
    return relative_buckets


def compute_position_bias(rel_bias_weight, query_length, key_length, *,
                          bidirectional, num_buckets, max_distance):
    """rel_bias_weight: [num_buckets, n_heads] -> [1, n_heads, q_len, k_len] (f32)."""
    context_position = jnp.arange(query_length, dtype=jnp.int32)[:, None]
    memory_position = jnp.arange(key_length, dtype=jnp.int32)[None, :]
    relative_position = memory_position - context_position
    rp_bucket = _relative_position_bucket(
        relative_position, bidirectional=bidirectional,
        num_buckets=num_buckets, max_distance=max_distance)
    values = rel_bias_weight.astype(jnp.float32)[rp_bucket]   # [q, k, H]
    values = jnp.transpose(values, (2, 0, 1))[None]           # [1, H, q, k]
    return values


# -----------------------------------------------------------------------------
# Weight preparation (call ONCE at init, not per forward).
# -----------------------------------------------------------------------------
def fuse_t5_attention_weights(wq, wk, wv, wo, dtype=None):
    """PyTorch nn.Linear layout in: wq/wk/wv [inner, d_model], wo [d_model, inner].
    Out: wqkv3 [3, d_model, inner], wo_t [inner, d_model] (optionally cast, e.g. bf16)."""
    wqkv3 = jnp.stack([wq.T, wk.T, wv.T], axis=0)
    wo_t = wo.T
    if dtype is not None:
        wqkv3 = wqkv3.astype(dtype)
        wo_t = wo_t.astype(dtype)
    return wqkv3, wo_t


# -----------------------------------------------------------------------------
# Full T5Attention forward (self-attention, eval mode, no cache).
# -----------------------------------------------------------------------------
def t5_attention(hidden_states, wqkv3, wo_t, *, n_heads, d_kv,
                 rel_bias_weight=None, mask=None, is_decoder=False,
                 relative_attention_num_buckets=32,
                 relative_attention_max_distance=128,
                 bias_dtype=None):
    """Returns (attn_output, present_key_value, position_bias) like the module."""
    B, S, D = hidden_states.shape
    inner = n_heads * d_kv
    compute_dtype = wqkv3.dtype
    bias_dtype = bias_dtype or compute_dtype

    x2d = hidden_states.astype(compute_dtype).reshape(B * S, D)

    # (1) fused Q/K/V projection -> [3, B, S, inner]  (free reshape only).
    qkv = pallas_qkv_proj(x2d, wqkv3).reshape(3, B, S, inner)

    # (2) per-head position bias (f32 master; streamed to the kernel at bias_dtype).
    if rel_bias_weight is not None:
        pb = compute_position_bias(
            rel_bias_weight, S, S,
            bidirectional=not is_decoder,
            num_buckets=relative_attention_num_buckets,
            max_distance=relative_attention_max_distance)        # [1, H, S, S] f32
    else:
        pb = jnp.zeros((1, n_heads, S, S), dtype=jnp.float32)
    bias_in = pb[0].astype(bias_dtype)                           # [H, S, S]

    mask_in = None
    if mask is not None:
        # Key-padding masks (broadcastable to [B, 1, Skv]) stay de-broadcast in-kernel.
        # TODO(synk): full [B, 1, Sq, Skv] masks would need a (tq, tkv) mask block.
        mask_in = jnp.reshape(mask, (B, 1, S)).astype(bias_dtype)

    # (3) attention core (all heads per step; lane-dense q/k/v/ctx).
    ctx = flash_attention(qkv, bias_in, mask_in, n_heads=n_heads, d_kv=d_kv)

    # (4) output projection.
    attn_output = pallas_matmul(ctx.reshape(B * S, inner), wo_t,
                                out_dtype=hidden_states.dtype).reshape(B, S, D)

    # Module-parity returned position_bias (includes mask when provided).
    position_bias = pb
    if mask is not None:
        position_bias = position_bias + jnp.reshape(mask, (B, 1, 1, S)).astype(jnp.float32)

    present_key_value = None   # is_decoder/use_cache path not exercised.
    return attn_output, present_key_value, position_bias.astype(hidden_states.dtype)


# -----------------------------------------------------------------------------
# Pure-JAX reference and demo.
# -----------------------------------------------------------------------------
def _ref_t5_attention(x, wq, wk, wv, wo, rel_w, n_heads, d_kv,
                      num_buckets, max_distance, is_decoder=False):
    B, S, D = x.shape

    def proj(w):
        return (x @ w.T).reshape(B, S, n_heads, d_kv).transpose(0, 2, 1, 3)

    q, k, v = proj(wq), proj(wk), proj(wv)
    scores = jnp.einsum("bhqd,bhkd->bhqk", q, k)
    pb = compute_position_bias(rel_w, S, S, bidirectional=not is_decoder,
                               num_buckets=num_buckets, max_distance=max_distance)
    scores = scores + pb
    attn = jax.nn.softmax(scores.astype(jnp.float32), axis=-1).astype(scores.dtype)
    ctx = jnp.einsum("bhqk,bhkd->bhqd", attn, v)
    ctx = ctx.transpose(0, 2, 1, 3).reshape(B, S, n_heads * d_kv)
    return ctx @ wo.T


if __name__ == "__main__":
    # Small T5-like config: d_model=32, 4 heads x d_kv=8 (inner_dim=32).
    B, S, D_MODEL, N_HEADS, D_KV = 2, 8, 32, 4, 8
    NUM_BUCKETS, MAX_DIST = 32, 128
    INNER = N_HEADS * D_KV

    key = jax.random.PRNGKey(0)
    kx, kq, kk, kv, ko, kb = jax.random.split(key, 6)

    x = jax.random.normal(kx, (B, S, D_MODEL), dtype=jnp.float32)
    # PyTorch nn.Linear layout: [out_features, in_features], bias=False.
    wq = jax.random.normal(kq, (INNER, D_MODEL), dtype=jnp.float32) * 0.05
    wk = jax.random.normal(kk, (INNER, D_MODEL), dtype=jnp.float32) * 0.05
    wv = jax.random.normal(kv, (INNER, D_MODEL), dtype=jnp.float32) * 0.05
    wo = jax.random.normal(ko, (D_MODEL, INNER), dtype=jnp.float32) * 0.05
    rel_bias = jax.random.normal(kb, (NUM_BUCKETS, N_HEADS), dtype=jnp.float32) * 0.1

    # f32 path (correctness check against plain-JAX reference).
    wqkv3, wo_t = fuse_t5_attention_weights(wq, wk, wv, wo)   # once, outside forward
    out, present_kv, pos_bias = t5_attention(
        x, wqkv3, wo_t, n_heads=N_HEADS, d_kv=D_KV,
        rel_bias_weight=rel_bias, mask=None, is_decoder=False,
        relative_attention_num_buckets=NUM_BUCKETS,
        relative_attention_max_distance=MAX_DIST)
    out = jax.block_until_ready(out)

    ref = _ref_t5_attention(x, wq, wk, wv, wo, rel_bias, N_HEADS, D_KV,
                            NUM_BUCKETS, MAX_DIST, is_decoder=False)

    assert out.shape == (B, S, D_MODEL)
    assert pos_bias.shape == (1, N_HEADS, S, S)
    assert present_kv is None
    max_err = float(jnp.max(jnp.abs(out - ref)))
    # approx reciprocal in the epilogue -> slightly looser tolerance than exact divide
    assert jnp.allclose(out, ref, atol=2e-3, rtol=2e-3), f"max_err={max_err}"

    # bf16 production path smoke test (halved DMA streams, full MXU rate, f32 accumulation).
    wqkv3_bf, wo_t_bf = fuse_t5_attention_weights(wq, wk, wv, wo, dtype=jnp.bfloat16)
    out_bf, _, _ = t5_attention(
        x.astype(jnp.bfloat16), wqkv3_bf, wo_t_bf, n_heads=N_HEADS, d_kv=D_KV,
        rel_bias_weight=rel_bias, mask=None, is_decoder=False,
        relative_attention_num_buckets=NUM_BUCKETS,
        relative_attention_max_distance=MAX_DIST)
    out_bf = jax.block_until_ready(out_bf)
    assert out_bf.shape == (B, S, D_MODEL)
    assert bool(jnp.all(jnp.isfinite(out_bf.astype(jnp.float32))))

    print("KERNEL_OK")
</pallas_src>

<mosaic_0001>
module attributes {stable_mosaic.version = 11 : i64} {
  func.func @_mm_kernel(%arg0: i32, %arg1: i32, %arg2: i32, %arg3: memref<16x32xf32, #tpu.memory_space<vmem>>, %arg4: memref<1x32x32xf32, #tpu.memory_space<vmem>>, %arg5: memref<1x16x32xf32, #tpu.memory_space<vmem>>) attributes {dimension_semantics = [#tpu.dimension_semantics<parallel>, #tpu.dimension_semantics<parallel>, #tpu.dimension_semantics<arbitrary>], iteration_bounds = array<i64: 1, 1, 3>, scalar_prefetch = 0 : i64, scratch_operands = 0 : i64, tpu.core_type = #tpu.core_type<tc>, window_params = [{transform_indices = @transform_0, window_bounds = array<i64: 16, 32>}, {transform_indices = @transform_1, window_bounds = array<i64: 1, 32, 32>}, {transform_indices = @transform_2, window_bounds = array<i64: 1, 16, 32>}]} {
    %c0 = arith.constant 0 : index
    %c0_0 = arith.constant 0 : index
    %0 = vector.load %arg3[%c0, %c0_0] : memref<16x32xf32, #tpu.memory_space<vmem>>, vector<16x32xf32>
    %c0_1 = arith.constant 0 : index
    %c0_2 = arith.constant 0 : index
    %c0_3 = arith.constant 0 : index
    %1 = vector.load %arg4[%c0_1, %c0_2, %c0_3] : memref<1x32x32xf32, #tpu.memory_space<vmem>>, vector<1x32x32xf32>
    %2 = vector.shape_cast %1 : vector<1x32x32xf32> to vector<32x32xf32>
    %cst = arith.constant dense<0.000000e+00> : vector<16x32xf32>
    %3 = tpu.matmul %0, %2, %cst {dimension_numbers = #tpu.dot_dimension_numbers<[1], [0], [0], [1], [0, 0, 1, 1], [], []>} : vector<16x32xf32>, vector<32x32xf32>, vector<16x32xf32> -> vector<16x32xf32>
    %c0_4 = arith.constant 0 : index
    %c0_5 = arith.constant 0 : index
    %c0_6 = arith.constant 0 : index
    %4 = vector.load %arg5[%c0_4, %c0_5, %c0_6] : memref<1x16x32xf32, #tpu.memory_space<vmem>>, vector<1x16x32xf32>
    %5 = vector.shape_cast %4 : vector<1x16x32xf32> to vector<16x32xf32>
    %6 = vector.shape_cast %3 : vector<16x32xf32> to vector<1x16x32xf32>
    tpu.vector_store %arg5[%c0_4, %c0_5, %c0_6], %6 {strides = array<i32>} : memref<1x16x32xf32, #tpu.memory_space<vmem>>, vector<1x16x32xf32>,
    return
  }
  func.func @transform_0(%arg0: i32, %arg1: i32, %arg2: i32) -> (i32, i32) {
    %c0_i32 = arith.constant 0 : i32
    %c0_i32_0 = arith.constant 0 : i32
    return %arg0, %c0_i32 : i32, i32
  }
  func.func @transform_1(%arg0: i32, %arg1: i32, %arg2: i32) -> (i32, i32, i32) {
    %c0_i32 = arith.constant 0 : i32
    %c0_i32_0 = arith.constant 0 : i32
    return %arg2, %c0_i32, %arg1 : i32, i32, i32
  }
  func.func @transform_2(%arg0: i32, %arg1: i32, %arg2: i32) -> (i32, i32, i32) {
    %c0_i32 = arith.constant 0 : i32
    return %arg2, %arg0, %arg1 : i32, i32, i32
  }
}

</mosaic_0001>

<bundles_post_ra>
// kernel: tpu_custom_call.1
= control target key start
LH: loop header
LB: loop body
LE: loop exit
PB: predicated region body
PF: predicated region fallthrough
CT: control target
= control target key end

     0   :  { %7 = vsyncpa [#allocation3], 0  ;;  %s943_s0 = inlined_call_operand.hbm [shape: f32[16,32], index: 0, kind: input, shape index: {}]   ;;  %s944_s1 = inlined_call_operand.hbm [shape: f32[3,32,32], index: 1, kind: input, shape index: {}]   ;;  %s945_s2 = inlined_call_operand.hbm [shape: f32[3,16,32], index: 2, kind: output, shape index: {}]  }
   0x1   :  { %8 = vsyncpa [#allocation6], 0 }
   0x2   :  { %10 = vsyncpa [#allocation6 + $0x1], 0 }
   0x3   :  { %11 = vsyncpa [#allocation4], 0 }
   0x4   :  { %13 = vsyncpa [#allocation4 + $0x1], 0  ;;  %s715_s9 = smov 0   ;;  %s717_s10 = smov 0  }
   0x5   :  { %s719_s11 = smov 0   ;;  %s721_s12 = smov 0  }
   0x6   :  { %s723_s13 = smov 0   ;;  %s725_s14 = smov 0  }
   0x7 LB: > { %s424_s15 = sadd.s32 4294967295, %s691_s14   ;;  %s425_s16 = sadd.s32 4294967294, %s691_s14   ;;  %s691_s14 = sphi %s725_s14, %s19_s14   ;;  %s687_s13 = sphi %s723_s13, %s968_s13   ;;  %s683_s12 = sphi %s721_s12, %s967_s12   ;;  %s679_s11 = sphi %s719_s11, %s966_s11   ;;  %s675_s10 = sphi %s717_s10, %s965_s10   ;;  %s671_s9 = sphi %s715_s9, %s964_s9  }
   0x8   : > { %p86_p0 = scmp.ne.s32.totalorder %s675_s10, %s671_s9  ;;  %p749_p1 = scmp.eq.s32.totalorder %s424_s15, 0 }
   0x9   : > { %p753_p2 = scmp.eq.s32.totalorder %s424_s15, 2  ;;  %p120_p3 = scmp.eq.s32.totalorder %s425_s16, 2 }
   0xa   : > { %s950_s17 = scalar_select %p749_p1, 1, 0 }
   0xb   : > { %s951_s18 = scalar_select %p753_p2, 1, 0 }
   0xc   : > { %p759_p4 = por %p749_p1, %p86_p0  ;;  %p426_p5 = scmp.ge.s32.totalorder %s691_s14, 1 }
   0xd   : > { %p764_p6 = por %p120_p3, %p86_p0  ;;  %p127_p7 = scmp.lt.s32.totalorder %s691_s14, 4 }
   0xe   : > { %s952_s19 = scalar_select %p759_p4, 1, 0 }
   0xf   : > { %s953_s20 = scalar_select %p764_p6, 1, 0 }
  0x10   : > { %p769_p8 = pnand %p426_p5, %p127_p7  ;;  %s693_s22 = smov [#allocation2]  }
  0x11   : > { %s142_s23 = sshll.u32 %s693_s22, 4  ;;  %s31_s25 = sadd.s32 1, %s687_s13  ;;  %s143_s23 = int_to_ptr.vmem [resolvable:$true] %s142_s23 }
  0x12   : > { %s954_s21 = scalar_select %p769_p8, 1, 0 }
  0x13   : > { %p478_p9 = pneg %p769_p8  ;;  %s547_s28 = scalar_lea.hbm %s943_s0, 256 }
  0x14   : > { %p548_p11 = scmp.ne.s32.totalorder %s943_s0, %s547_s28  ;;  %p554_p3 = scmp.lt.u32.totalorder %s547_s28, %s943_s0 }
  0x15   : > { %p777_p10 = pnand %p478_p9, %p749_p1 }
  0x17   : > { %p549_p12 = pneg %p777_p10 }
  0x19   : > { %p550_p13 = pnand %p549_p12, %p548_p11 }
  0x1b   : > { %p551_p0 = pneg %p550_p13 }
  0x1d   : > { %p556_p5 = pnand %p554_p3, %p551_p0 }
  0x1f   : > { %559 = shalt.err (!%p556_p5)
}
  0x20   : > { %s560_s5 = scalar_lea.vmem %s143_s23, 256  ;;  %p568_p4 = scmp.lt.s32.totalorder %s143_s23, %s143_s23 }
  0x21   : > { %p561_p7 = scmp.ne.s32.totalorder %s143_s23, %s560_s5  ;;  %p569_p1 = scmp.lt.s32.totalorder %s560_s5, %s560_s5 }
  0x23   : > { %p563_p9 = pnand %p561_p7, %p549_p12  ;;  %p570_p8 = por %p569_p1, %p568_p4 }
  0x25   : > { %p564_p6 = pneg %p563_p9 }
  0x27   : > { %p571_p2 = pnand %p570_p8, %p564_p6 }
  0x29   : > { %574 = shalt.err (!%p571_p2)
}
  0x2a   : > { %s694_s6 = smov 128   ;;  %s695_s7 = smov 8  }
  0x2b   : > { %481 = dma.hbm_to_vmem [thread:$0]  (!%p777_p10), %s943_s0, 256, %s143_s23, [#allocation3], %s694_s6, %s694_s6, %s695_s7  }
  0x2c   : > { %p32_p1 = scmp.ge.s32.totalorder %s31_s25, 3  ;;  %s73_s16 = sadd.s32 1, %s679_s11 }
  0x2d   : > { %p80_p2 = scmp.ne.s32.totalorder %s679_s11, %s675_s10  ;;  %p81_p4 = scmp.eq.s32.totalorder %s691_s14, 0 }
  0x2e   : > { %s970_s25 = smov (%p32_p1, %s31_s25), 0  ;;  %p957_p8 = scmp.ne.s32.totalorder %s951_s18, 0 }
  0x2f   : > { %p807_p6 = por %p81_p4, %p80_p2  ;;  %s68_s26 = ssub.s32 %s687_s13, %s970_s25 }
  0x30   : > { %p813_p11 = por %p957_p8, %p80_p2  ;;  %p491_p12 = scmp.lt.s32.totalorder %s691_s14, 3 }
  0x31   : > { %p71_p10 = scmp.eq.s32.totalorder %s68_s26, 0  ;;  %s156_s23 = sand.u32 1, %s679_s11  }
  0x32   : > { %s429_s27 = sshll.u32 %s156_s23, 5  ;;  %s443_s29 = sshll.u32 %s687_s13, 9 }
  0x33   : > { %s822_s28 = scalar_select %p71_p10, %s679_s11, %s73_s16  }
  0x34   : > { %s828_s4 = scalar_lea.hbm %s944_s1, %s443_s29  ;;  %s160_s18 = scalar_lea.vmem [#allocation5], %s429_s27 }
  0x35   : > { %s168_s5 = sshll.u32 %s160_s18, 4  ;;  %p834_p13 = pnand %p491_p12, %p807_p6  ;;  %s830_s5 = int_to_ptr.vmem [resolvable:$true] %s168_s5 }
  0x36   : > { %s838_s15 = scalar_lea.sflag [#allocation6], %s156_s23  ;;  %s575_s16 = scalar_lea.hbm %s828_s4, 512 }
  0x37   : > { %p576_p0 = scmp.ne.s32.totalorder %s828_s4, %s575_s16  ;;  %p577_p3 = pneg %p834_p13 }
  0x38   : > { %s580_s22 = scalar_lea.hbm %s944_s1, 1536  ;;  %p581_p9 = scmp.lt.u32.totalorder %s828_s4, %s944_s1 }
  0x39   : > { %p578_p5 = pnand %p577_p3, %p576_p0  ;;  %p582_p1 = scmp.lt.u32.totalorder %s580_s22, %s575_s16 }
  0x3a   : > { %p584_p4 = scmp.lt.u32.totalorder %s575_s16, %s828_s4 }
  0x3b   : > { %p579_p7 = pneg %p578_p5  ;;  %p583_p2 = por %p582_p1, %p581_p9 }
  0x3d   : > { %p585_p6 = por %p584_p4, %p583_p2 }
  0x3f   : > { %p586_p8 = pnand %p585_p6, %p579_p7 }
  0x41   : > { %589 = shalt.err (!%p586_p8)
}
  0x42   : > { %s590_s23 = scalar_lea.vmem %s830_s5, 512  ;;  %s696_s3 = smov [#allocation5]  }
  0x43   : > { %p591_p12 = scmp.ne.s32.totalorder %s830_s5, %s590_s23  ;;  %s595_s18 = sshll.u32 %s696_s3, 4  ;;  %s596_s18 = int_to_ptr.vmem [resolvable:$false] %s595_s18 }
  0x44   : > { %s597_s26 = scalar_lea.vmem %s596_s18, 1024  ;;  %p598_p5 = scmp.lt.s32.totalorder %s830_s5, %s596_s18 }
  0x45   : > { %p593_p10 = pnand %p591_p12, %p577_p3  ;;  %p599_p9 = scmp.lt.s32.totalorder %s597_s26, %s590_s23 }
  0x47   : > { %p594_p0 = pneg %p593_p10  ;;  %p600_p1 = por %p599_p9, %p598_p5 }
  0x49   : > { %p601_p2 = pnand %p600_p1, %p594_p0 }
  0x4b   : > { %604 = shalt.err (!%p601_p2)
}
  0x4c   : > { %485 = dma.hbm_to_vmem [thread:$0]  (!%p834_p13), %s828_s4, 512, %s830_s5, %s838_s15, %s694_s6, %s694_s6, %s695_s7  }
  0x4d   : > { %p960_p3 = scmp.ne.s32.totalorder %s954_s21, 0 }
  0x4e   : > { %p961_p7 = scmp.ne.s32.totalorder (!%p960_p3), %s950_s17, 0 }
  0x4f   : > { %180 = sbr.rel (%p960_p3) target bundleno = 330 (0x14a), region = 28 }
  0x56   : > { %658 = dma.done.wait (%p961_p7), [#allocation3], 256  }
  0x57   : > { %660 = vsyncadd (%p961_p7), [#allocation3], 4294967040  ;;  %s876_s16 = sand.u32 1, %s675_s10   ;;  %p962_p4 = scmp.ne.s32.totalorder %s952_s19, 0 }
  0x58   : > { %s434_s8 = sshll.u32 %s876_s16, 5  ;;  %s187_s27 = scalar_lea.sflag [#allocation6], %s876_s16 }
  0x59   : > { %s190_s22 = scalar_lea.vmem [#allocation5], %s434_s8 }
  0x5a   : > { %662 = dma.done.wait (%p962_p4), %s187_s27, 512  }
  0x5b   : > { %664 = vsyncadd (%p962_p4), %s187_s27, 4294966784  ;;  %vm219_vm0 = vcmask 261120   ;;  %v215_v0 = vld [vmem:[%s190_s22] sm:$0xff]  ;;  %v216_v1 = vld [vmem:[%s190_s22 + $0x8] sm:$0xff]  ;;  %s435_s17 = sshll.u32 %s876_s16, 4  ;;  %s444_s6 = sshll.u32 %s683_s12, 8 }
  0x5c   : > { %v217_v2 = vld [vmem:[%s190_s22 + $0x10] sm:$0xff]  ;;  %v462_v3 = vpack.c.bf16 %v216_v1, %v215_v0  ;;  %v218_v4 = vld [vmem:[%s190_s22 + $0x18] sm:$0xff]  ;;  %s210_s19 = scalar_lea.vmem [#allocation7], %s435_s17  ;;  %s893_s5 = scalar_lea.hbm %s945_s2, %s444_s6 }
  0x5d   : > { %v213_v5 = vld [vmem:[#allocation2] sm:$0xff]  ;;  %v466_v6 = vpack.c.bf16 %v218_v4, %v217_v2  ;;  %v214_v7 = vld [vmem:[#allocation2 + $0x8] sm:$0xff]  ;;  %s320_s21 = sshll.u32 %s210_s19, 4  ;;  %s304_s15 = scalar_lea.sflag [#allocation4], %s876_s16  ;;  %s888_s21 = int_to_ptr.vmem [resolvable:$true] %s320_s21 }
  0x5e   : > { %459 = vmatprep.mubr.msk.f32.mxu0 %vm219_vm0, %v213_v5  ;;  %463 = vmatprep.subr.bf16.mxu0 %v462_v3  ;;  %s605_s29 = scalar_lea.vmem %s888_s21, 256  ;;  %s697_s12 = smov [#allocation7]  }
  0x5f   : > { %465 = vmatpush3.bf16.msra.mxu0 %v462_v3  ;;  %p606_p13 = scmp.ne.s32.totalorder %s888_s21, %s605_s29  ;;  %s609_s30 = sshll.u32 %s697_s12, 4  ;;  %s610_s30 = int_to_ptr.vmem [resolvable:$false] %s609_s30 }
  0x60   : > { %467 = vmatprep.subr.bf16.mxu0 %v466_v6  ;;  %s611_s23 = scalar_lea.vmem %s610_s30, 512  ;;  %p612_p12 = scmp.lt.s32.totalorder %s888_s21, %s610_s30 }
  0x61   : > { %p607_p6 = pnand %p606_p13, %p813_p11  ;;  %p613_p10 = scmp.lt.s32.totalorder %s611_s23, %s605_s29 }
  0x63   : > { %469 = vmatpush3.bf16.msra.mxu0 %v466_v6  ;;  %p608_p8 = pneg %p607_p6  ;;  %p614_p0 = por %p613_p10, %p612_p12 }
  0x65   : > { %p615_p5 = pnand %p614_p0, %p608_p8 }
  0x66   : > { %460 = vmatmul.mubr.msk.f32.vlgmr.msra.gmra.mrb[0].mxu0 %vm219_vm0, %v214_v7 }
 0x139   : > { %v461_v8 = vpop.f32.mrb[0].mxu0 }
 0x13a   : > { %302 = vst.msk [vmem:[%s210_s19 + $0x8] sm:$0xff] %vm219_vm0, %v461_v8  ;;  %v292_v9 = vpop.f32.mrb[1].mxu0 }
 0x13b   : > { %301 = vst.msk [vmem:[%s210_s19] sm:$0xff] %vm219_vm0, %v292_v9 }
 0x13c   : > { %618 = shalt.err (!%p615_p5)
}
 0x13d   : > { %s619_s3 = scalar_lea.hbm %s893_s5, 256  ;;  %s623_s8 = scalar_lea.hbm %s945_s2, 768 }
 0x13e   : > { %p620_p9 = scmp.ne.s32.totalorder %s893_s5, %s619_s3  ;;  %p624_p3 = scmp.lt.u32.totalorder %s893_s5, %s945_s2 }
 0x13f   : > { %p625_p7 = scmp.lt.u32.totalorder %s623_s8, %s619_s3  ;;  %p627_p13 = scmp.lt.u32.totalorder %s619_s3, %s893_s5 }
 0x140   : > { %p621_p1 = pnand %p620_p9, %p813_p11 }
 0x141   : > { %p626_p4 = por %p625_p7, %p624_p3 }
 0x142   : > { %p622_p2 = pneg %p621_p1 }
 0x143   : > { %p628_p6 = por %p627_p13, %p626_p4 }
 0x145   : > { %p629_p8 = pnand %p628_p6, %p622_p2 }
 0x147   : > { %632 = shalt.err (!%p629_p8)
}
 0x148   : > { %s698_s17 = smov 128   ;;  %s699_s19 = smov 8  }
 0x149   : > { %476 = dma.vmem_to_hbm [thread:$0]  (%p813_p11), %s888_s21, 256, %s893_s5, %s304_s15, %s698_s17, %s698_s17, %s699_s19  }
 0x14a PF: > { %p493_p12 = scmp.ge.s32.totalorder %s691_s14, 2  ;;  %s335_s6 = sand.u32 1, %s671_s9  }
 0x14b   : > { %p963_p10 = scmp.ne.s32.totalorder %s953_s20, 0  ;;  %s336_s7 = scalar_lea.sflag [#allocation4], %s335_s6 }
 0x14d   : > { %p487_p0 = pnand %p493_p12, %p963_p10 }
 0x14f   : > { %666 = dma.done.wait (!%p487_p0), %s336_s7, 256  }
 0x150   : > { %668 = vsyncadd (!%p487_p0), %s336_s7, 4294967040  ;;  %s19_s14 = sadd.s32 1, %s691_s14   ;;  %s964_s9 = smov %s675_s10 }
 0x151   : > { %p16_p5 = scmp.ge.s32.totalorder %s19_s14, 5   ;;  %s965_s10 = smov %s679_s11 }
 0x152   : > { %s966_s11 = smov %s822_s28  ;;  %s967_s12 = smov %s687_s13 }
 0x153   : > { %s968_s13 = smov %s970_s25  ;;  %18 = sbr.rel (!%p16_p5) target bundleno = 7 (0x7), region = 79 }
 0x15a   :  { %341 = vsyncpa [#allocation3], 1 }
 0x15b   :  { %343 = vsyncpa [#allocation3 + $0x1], 1 }
 0x15c   :  { %344 = vsyncpa [#allocation6], 1 }
 0x15d   :  { %346 = vsyncpa [#allocation6 + $0x1], 1 }
 0x15e   :  { %347 = vsyncpa [#allocation4], 1 }
 0x15f   :  { %349 = vsyncpa [#allocation4 + $0x1], 1 }

</bundles_post_ra>
